<compile_context>
chip_gen: v7x
topology: tpu7x:2x2x1
jax: 0.10.0
libtpu: 0.0.40
codegen_flags: <defaults>
</compile_context>

<pallas_src>
import functools

import jax
import jax.numpy as jnp
from jax.experimental import pallas as pl
from jax.experimental.pallas import tpu as pltpu

SCALE = 1.0 / 0.6  # ScaledSiLU.scale_factor  (forward = silu(x) * (1/0.6))

_MIB = 1024 * 1024

# Widest lane count first: lane-dense output stores (unmasked vst) are the
# biggest single lever for mem-bound elementwise kernels.
_LANES_MENU = (1024, 512, 256, 128)


def _scaled_silu_kernel(x_ref, o_ref):
    x = x_ref[...]
    if x.dtype == jnp.bfloat16:
        # bf16 VPU/EUP path (native on v6e/v7x; Mosaic upcasts internally on
        # v5e). Halves vreg pressure vs an explicit f32 upcast.  NOTE: this is
        # compute-in-bf16 (incl. the weak-typed SCALE), so it differs by ~1 ulp
        # from a compute-in-f32-then-cast reference — fine for an activation.
        y = x * jax.nn.sigmoid(x) * SCALE
    else:
        xf = x.astype(jnp.float32)
        y = xf * jax.nn.sigmoid(xf) * SCALE
    o_ref[...] = y.astype(o_ref.dtype)


@functools.lru_cache(maxsize=1)
def _chip_config():
    """Returns (target_block_bytes, vmem_limit_bytes) for the current chip.

    The kernel is HBM-bound, so block size only needs to amortize the
    ~0.35 us/step grid overhead against the per-step DMA time:
      v7x: 3.2 TB/s HBM, 64 MiB VMEM/TC  -> 6 MiB blocks (24 MiB double-
           buffered), explicit 48 MiB vmem limit.
      v6e: 1.4 TB/s HBM, 128 MiB VMEM    -> 4 MiB blocks, 32 MiB limit.
      v5e: 0.8 TB/s HBM, 16 MiB scoped default -> keep 2 MiB blocks (8 MiB
           double-buffered), leave the default limit alone.
    """
    vmem_cap = None
    try:
        vmem_cap = getattr(pltpu.get_tpu_info(), "vmem_capacity_bytes", None)
    except Exception:
        vmem_cap = None
    kind = ""
    try:
        kind = jax.devices()[0].device_kind.lower()
    except Exception:
        kind = ""

    is_v7x = (vmem_cap is not None and vmem_cap <= 96 * _MIB) or ("v7" in kind)
    if is_v7x:
        return 6 * _MIB, 48 * _MIB
    if "v5" in kind:
        return 2 * _MIB, None
    # v6e and any other large-VMEM generation.
    return 4 * _MIB, 32 * _MIB


def _sublane_multiple(dtype):
    # f32 -> 8, bf16/f16 -> 16, int8/fp8 -> 32 (sub-32-bit packs along sublanes).
    itemsize = jnp.dtype(dtype).itemsize
    return max(8, 32 // max(1, itemsize))


def _pick_lanes(n):
    for cand in _LANES_MENU:
        if n % cand == 0:
            return cand
    return None


def _run_aligned_2d(x2d, donate_input):
    """Pallas pass over a contiguous (rows, lanes) slab, lanes % 128 == 0."""
    rows, lanes = x2d.shape
    dtype = x2d.dtype
    itemsize = jnp.dtype(dtype).itemsize
    block_bytes, vmem_limit = _chip_config()

    # Block-row menu depends only on dtype/lanes/chip (not on n): distinct
    # large tensor sizes reuse the same Mosaic compilation.
    sub = _sublane_multiple(dtype)
    tile_rows = max(sub, (block_bytes // (lanes * itemsize)) // sub * sub)
    if rows <= tile_rows:
        # Small input: single whole-array block (always a legal block shape).
        tile_rows = rows

    grid = (pl.cdiv(rows, tile_rows),)
    n = rows * lanes
    return pl.pallas_call(
        _scaled_silu_kernel,
        out_shape=jax.ShapeDtypeStruct((rows, lanes), dtype),
        grid_spec=pltpu.PrefetchScalarGridSpec(
            num_scalar_prefetch=0,
            grid=grid,
            in_specs=[pl.BlockSpec((tile_rows, lanes), lambda i: (i, 0))],
            out_specs=pl.BlockSpec((tile_rows, lanes), lambda i: (i, 0)),
        ),
        compiler_params=pltpu.CompilerParams(
            # 1-D grid marked "parallel" so the runtime may shard steps across
            # v7x's two TensorCores whenever the grid has >= 2 steps.
            # pltpu.CORE_PARALLEL would force the split but constrains
            # lowering; only switch after profiling shows one TC can't
            # saturate HBM.
            dimension_semantics=("parallel",),
            vmem_limit_bytes=vmem_limit,
        ),
        # Advisory: mem-bound elementwise op (1 read + 1 write, 1 exp/elem).
        cost_estimate=pl.CostEstimate(
            flops=3 * n, transcendentals=n, bytes_accessed=2 * n * itemsize),
        # Optional donation: same HBM traffic, half the peak footprint.
        input_output_aliases=({0: 0} if donate_input else {}),
    )(x2d)


def scaled_silu_pallas(x, donate_input=False):
    """Applies ScaledSiLU (silu(x) * (1/0.6)) elementwise to any-shaped array.

    Set donate_input=True only when the caller no longer needs `x`.
    """
    orig_shape = x.shape
    n = x.size
    if n == 0:
        return x

    lanes = _pick_lanes(n)
    if lanes is None:
        # Rare ragged path (element count not a multiple of 128).  Any
        # pad/slice/concat around the Pallas call costs >=1 extra full HBM
        # pass, so the roofline-optimal choice is one fused XLA elementwise
        # pass (exactly 1 read + 1 write).
        xf = x.astype(jnp.float32)
        return (xf * jax.nn.sigmoid(xf) * SCALE).astype(x.dtype)

    rows = n // lanes
    out = _run_aligned_2d(x.reshape(rows, lanes), donate_input)  # free reshape
    return out.reshape(orig_shape)


def _reference(x):
    xf = x.astype(jnp.float32)
    return (xf * jax.nn.sigmoid(xf) * SCALE).astype(x.dtype)


if __name__ == "__main__":
    key = jax.random.PRNGKey(0)

    # Primary case: NCHW activation, lane-aligned (2*4*16*16 = 2048 elements).
    x = jax.random.normal(key, (2, 4, 16, 16), dtype=jnp.float32)
    y = scaled_silu_pallas(x)
    jax.block_until_ready(y)
    y_ref = _reference(x)
    assert y.shape == x.shape and y.dtype == x.dtype
    assert jnp.allclose(y, y_ref, atol=1e-5, rtol=1e-5), "f32 mismatch vs reference"

    # Ragged fallback path (element count not a multiple of 128).
    x_odd = jax.random.normal(jax.random.PRNGKey(1), (3, 5, 7), dtype=jnp.float32)
    y_odd = scaled_silu_pallas(x_odd)
    jax.block_until_ready(y_odd)
    assert jnp.allclose(y_odd, _reference(x_odd), atol=1e-5, rtol=1e-5), \
        "ragged-path mismatch vs reference"

    # bf16 path (native bf16 compute inside the kernel).
    x_bf16 = x.astype(jnp.bfloat16)
    y_bf16 = scaled_silu_pallas(x_bf16)
    jax.block_until_ready(y_bf16)
    assert y_bf16.dtype == jnp.bfloat16
    assert jnp.allclose(y_bf16.astype(jnp.float32), _reference(x),
                        atol=0.1, rtol=0.1), "bf16 mismatch vs reference"

    # Multi-block path: grid has >= 2 steps on every generation, with a ragged
    # last row-block (exercises generation-aware block sizing + partial tiles).
    x_big = jax.random.normal(jax.random.PRNGKey(2), (2056, 1024),
                              dtype=jnp.float32)
    y_big = scaled_silu_pallas(x_big)
    jax.block_until_ready(y_big)
    assert jnp.allclose(y_big, _reference(x_big), atol=1e-5, rtol=1e-5), \
        "multi-block mismatch vs reference"

    print("KERNEL_OK")
</pallas_src>

<mosaic_0001>
module attributes {stable_mosaic.version = 11 : i64} {
  func.func @_scaled_silu_kernel(%arg0: i32, %arg1: memref<2x1024xf32, #tpu.memory_space<vmem>>, %arg2: memref<2x1024xf32, #tpu.memory_space<vmem>>) attributes {dimension_semantics = [#tpu.dimension_semantics<parallel>], iteration_bounds = array<i64: 1>, scalar_prefetch = 0 : i64, scratch_operands = 0 : i64, tpu.core_type = #tpu.core_type<tc>, window_params = [{transform_indices = @transform_0, window_bounds = array<i64: 2, 1024>}, {transform_indices = @transform_1, window_bounds = array<i64: 2, 1024>}]} {
    %c0 = arith.constant 0 : index
    %c0_0 = arith.constant 0 : index
    %0 = vector.load %arg1[%c0, %c0_0] : memref<2x1024xf32, #tpu.memory_space<vmem>>, vector<2x1024xf32>
    %1 = arith.negf %0 : vector<2x1024xf32>
    %2 = math.exp %1 : vector<2x1024xf32>
    %cst = arith.constant 1.000000e+00 : f32
    %3 = vector.broadcast %cst : f32 to vector<2x1024xf32>
    %4 = arith.addf %3, %2 : vector<2x1024xf32>
    %5 = arith.divf %3, %4 : vector<2x1024xf32>
    %6 = arith.mulf %0, %5 : vector<2x1024xf32>
    %cst_1 = arith.constant 1.66666663 : f32
    %7 = vector.broadcast %cst_1 : f32 to vector<2x1024xf32>
    %8 = arith.mulf %6, %7 : vector<2x1024xf32>
    %c0_2 = arith.constant 0 : index
    %c0_3 = arith.constant 0 : index
    %9 = vector.load %arg2[%c0_2, %c0_3] : memref<2x1024xf32, #tpu.memory_space<vmem>>, vector<2x1024xf32>
    tpu.vector_store %arg2[%c0_2, %c0_3], %8 {strides = array<i32>} : memref<2x1024xf32, #tpu.memory_space<vmem>>, vector<2x1024xf32>,
    return
  }
  func.func @transform_0(%arg0: i32) -> (i32, i32) {
    %c0_i32 = arith.constant 0 : i32
    %c0_i32_0 = arith.constant 0 : i32
    return %arg0, %c0_i32 : i32, i32
  }
  func.func @transform_1(%arg0: i32) -> (i32, i32) {
    %c0_i32 = arith.constant 0 : i32
    %c0_i32_0 = arith.constant 0 : i32
    return %arg0, %c0_i32 : i32, i32
  }
}

</mosaic_0001>

<bundles_post_ra>
// kernel: tpu_custom_call.1
= control target key start
LH: loop header
LB: loop body
LE: loop exit
PB: predicated region body
PF: predicated region fallthrough
CT: control target
= control target key end

     0   :  { %6 = vsyncpa [#allocation3], 0  ;;  %s152_s0 = inlined_call_operand.hbm [shape: f32[2,1024], index: 0, kind: input, shape index: {}]   ;;  %s153_s1 = inlined_call_operand.hbm [shape: f32[2,1024], index: 1, kind: output, shape index: {}]  }
   0x1   :  { %7 = vsyncpa [#allocation4], 0  ;;  %s116_s6 = smov [#allocation2]   ;;  %s68_s10 = scalar_lea.hbm %s152_s0, 256 }
   0x2   :  { %s14_s7 = sshll.u32 %s116_s6, 4  ;;  %p69_p0 = scmp.ne.s32.totalorder %s152_s0, %s68_s10  ;;  %s15_s7 = int_to_ptr.vmem [resolvable:$true] %s14_s7 }
   0x3   :  { %p72_p1 = scmp.lt.u32.totalorder %s68_s10, %s152_s0 }
   0x5   :  { %p74_p2 = pnand %p72_p1, %p69_p0 }
   0x7   :  { %77 = shalt.err (!%p74_p2)
}
   0x8   :  { %s78_s15 = scalar_lea.vmem %s15_s7, 256  ;;  %p83_p4 = scmp.lt.s32.totalorder %s15_s7, %s15_s7 }
   0x9   :  { %p79_p3 = scmp.ne.s32.totalorder %s15_s7, %s78_s15  ;;  %p84_p5 = scmp.lt.s32.totalorder %s78_s15, %s78_s15 }
   0xb   :  { %p85_p6 = por %p84_p5, %p83_p4 }
   0xd   :  { %p86_p7 = pnand %p85_p6, %p79_p3 }
   0xf   :  { %89 = shalt.err (!%p86_p7)
}
  0x10   :  { %17 = dma.hbm_to_vmem [thread:$0]  %s152_s0, 256, %s15_s7, [#allocation3]  }
  0x11   :  { %112 = dma.done.wait [#allocation3], 256  }
  0x12   :  { %113 = vsyncadd [#allocation3], 4294967040  ;;  %v21_v0 = vld [vmem:[#allocation2] sm:$0xff]  ;;  %v22_v1 = vld [vmem:[#allocation2 + $0x8] sm:$0xff]  ;;  %s117_s18 = smov [#allocation5]  }
  0x13   :  { %v56_v2 = vmul.f32 -1.442695, %v21_v0  ;;  %v57_v3 = vmul.f32 -1.442695, %v22_v1  ;;  %s47_s19 = sshll.u32 %s117_s18, 4  ;;  %s48_s19 = int_to_ptr.vmem [resolvable:$true] %s47_s19 }
  0x14   :  { %s90_s0 = scalar_lea.vmem %s48_s19, 256  ;;  %p95_p9 = scmp.lt.s32.totalorder %s48_s19, %s48_s19 }
  0x15   :  { %60 = vpow2.f32 %v56_v2  ;;  %p91_p8 = scmp.ne.s32.totalorder %s48_s19, %s90_s0  ;;  %p96_p10 = scmp.lt.s32.totalorder %s90_s0, %s90_s0 }
  0x16   :  { %62 = vpow2.f32 %v57_v3 }
  0x17   :  { %p97_p11 = por %p96_p10, %p95_p9 }
  0x19   :  { %p98_p12 = pnand %p97_p11, %p91_p8 }
  0x1f   :  { %v61_v4 = vpop.eup %60 }
  0x20   :  { %v63_v5 = vpop.eup %62  ;;  %v29_v6 = vadd.f32 1.0, %v61_v4 }
  0x21   :  { %v30_v7 = vadd.f32 1.0, %v63_v5 }
  0x22   :  { %64 = vrcp.f32 %v29_v6 }
  0x23   :  { %66 = vrcp.f32 %v30_v7 }
  0x2c   :  { %v65_v8 = vpop.eup %64 }
  0x2d   :  { %v67_v9 = vpop.eup %66  ;;  %v35_v10 = vmul.f32 %v65_v8, %v21_v0 }
  0x2e   :  { %v36_v11 = vmul.f32 %v67_v9, %v22_v1 }
  0x2f   :  { %v37_v12 = vmul.f32 1.6666666, %v35_v10 }
  0x30   :  { %v38_v13 = vmul.f32 1.6666666, %v36_v11 }
  0x31   :  { %39 = vst [vmem:[#allocation5] sm:$0xff] %v37_v12 }
  0x32   :  { %40 = vst [vmem:[#allocation5 + $0x8] sm:$0xff] %v38_v13 }
  0x33   :  { %101 = shalt.err (!%p98_p12)
}
  0x34   :  { %s102_s22 = scalar_lea.hbm %s153_s1, 256 }
  0x35   :  { %p103_p13 = scmp.ne.s32.totalorder %s153_s1, %s102_s22  ;;  %p106_p0 = scmp.lt.u32.totalorder %s102_s22, %s153_s1 }
  0x37   :  { %p108_p1 = pnand %p106_p0, %p103_p13 }
  0x39   :  { %111 = shalt.err (!%p108_p1)
}
  0x3a   :  { %50 = dma.vmem_to_hbm [thread:$0]  %s48_s19, 256, %s153_s1, [#allocation4]  }
  0x3b   :  { %114 = dma.done.wait [#allocation4], 256  }
  0x3c   :  { %115 = vsyncadd [#allocation4], 4294967040 }
  0x3d   :  { %54 = vsyncpa [#allocation3], 1 }
  0x3e   :  { %55 = vsyncpa [#allocation4], 1 }

</bundles_post_ra>
